<compile_context>
chip_gen: v7x
topology: tpu7x:2x2x1
jax: 0.10.0
libtpu: 0.0.40
codegen_flags: <defaults>
</compile_context>

<pallas_src>
import numpy as np
import jax
import jax.numpy as jnp
from jax import lax
from jax.experimental import pallas as pl
from jax.experimental.pallas import tpu as pltpu


# ----------------------------------------------------------------------------
# Wrapper-side construction of the structured operand matrices (plain JAX).
# ----------------------------------------------------------------------------
def _upsample_matrix(n):
    """(2n, n) matrix implementing 1-D x2 bilinear upsampling, align_corners=False."""
    U = np.zeros((2 * n, n), np.float32)
    for i in range(n):
        U[2 * i, i] += 0.75
        U[2 * i, max(i - 1, 0)] += 0.25
        U[2 * i + 1, i] += 0.75
        U[2 * i + 1, min(i + 1, n - 1)] += 0.25
    return jnp.asarray(U)


def _conv_band_matrices(wk, width):
    """Banded tap matrices for a 3x3 'same' conv in flat (H, W*Cin) layout.

    wk: (3, 3, Cin, Cout).  Returns (3, W*Cin, W*Cout); y_flat @ B[dy] is the
    contribution of kernel row dy for all W output columns (out-of-image dx
    taps are dropped, i.e. zero padding).
    """
    taps = [jnp.eye(width, k=1, dtype=wk.dtype),    # dx = 0 (left neighbour)
            jnp.eye(width, k=0, dtype=wk.dtype),    # dx = 1 (centre)
            jnp.eye(width, k=-1, dtype=wk.dtype)]   # dx = 2 (right neighbour)
    mats = []
    for dy in range(3):
        B = jnp.zeros((width * wk.shape[2], width * wk.shape[3]), wk.dtype)
        for dx in range(3):
            B = B + jnp.kron(taps[dx], wk[dy, dx])
        mats.append(B)
    return jnp.stack(mats, axis=0)


def _row_shift_matrices(h):
    """(2, H, H): S[0] selects row h-1 (dy=0 tap), S[1] selects row h+1 (dy=2)."""
    return jnp.stack([jnp.eye(h, k=-1, dtype=jnp.float32),
                      jnp.eye(h, k=1, dtype=jnp.float32)], axis=0)


# ----------------------------------------------------------------------------
# Pallas kernels
# ----------------------------------------------------------------------------
def _make_scale_head_kernel(num_convs, upsample):
    """Fused scale-head kernel: [conv3x3+ReLU, (x2 upsample)?] * num_convs."""
    def kernel(*refs):
        x_ref, o_ref = refs[0], refs[-1]
        p = refs[1:-1]
        y = x_ref[0].astype(jnp.float32)                 # (H, W*Cin), lane-dense
        i = 0
        for _ in range(num_convs):
            b_band, s_shift, b_bias = p[i], p[i + 1], p[i + 2]
            i += 3
            m0 = jnp.dot(y, b_band[0], preferred_element_type=jnp.float32)
            m1 = jnp.dot(y, b_band[1], preferred_element_type=jnp.float32)
            m2 = jnp.dot(y, b_band[2], preferred_element_type=jnp.float32)
            acc = (jnp.dot(s_shift[0], m0, preferred_element_type=jnp.float32)
                   + m1
                   + jnp.dot(s_shift[1], m2, preferred_element_type=jnp.float32))
            y = jnp.maximum(acc + b_bias[...], 0.0)      # (H, W*D)
            if upsample:
                uh, bw = p[i], p[i + 1]
                i += 2
                y = jnp.dot(uh[...], y, preferred_element_type=jnp.float32)   # H axis
                y = jnp.dot(y, bw[...], preferred_element_type=jnp.float32)   # W axis
        o_ref[0] = y.astype(o_ref.dtype)                 # lane-dense store
    return kernel


def _make_predictor_kernel(num_levels):
    """Fused: sum of FPN-level planes + 1x1 predictor conv (block-diag matmul)."""
    def kernel(*refs):
        x_refs = refs[:num_levels]
        w_ref, b_ref, o_ref = refs[num_levels], refs[num_levels + 1], refs[num_levels + 2]
        s = x_refs[0][0].astype(jnp.float32)
        for r in x_refs[1:]:
            s = s + r[0].astype(jnp.float32)
        out = jnp.dot(s, w_ref[...], preferred_element_type=jnp.float32) + b_ref[...]
        o_ref[0] = out.astype(o_ref.dtype)
    return kernel


# ----------------------------------------------------------------------------
# Wrappers
# ----------------------------------------------------------------------------
def scale_head_level(feat, convs, upsample, conv_dims):
    """feat: (N, H, W, Cin) NHWC.  Returns (N, Hc, Wc*conv_dims), lane-flat."""
    N, H, W, Cin = feat.shape
    D = conv_dims
    x_flat = feat.reshape(N, H, W * Cin)                 # free HBM reshape

    args = [x_flat]
    in_specs = [pl.BlockSpec((1, H, W * Cin), lambda n: (n, 0, 0))]

    h, wdt = H, W
    for (wk, bk) in convs:
        band = _conv_band_matrices(wk, wdt)              # (3, wdt*cin, wdt*D)
        shift = _row_shift_matrices(h)                   # (2, h, h)
        bflat = jnp.tile(bk.reshape(1, D), (1, wdt))     # (1, wdt*D)
        args += [band, shift, bflat]
        in_specs += [pl.BlockSpec(band.shape, lambda n: (0, 0, 0)),
                     pl.BlockSpec(shift.shape, lambda n: (0, 0, 0)),
                     pl.BlockSpec(bflat.shape, lambda n: (0, 0))]
        if upsample:
            uh = _upsample_matrix(h)                     # (2h, h)
            bw = jnp.kron(_upsample_matrix(wdt).T,
                          jnp.eye(D, dtype=jnp.float32))  # (wdt*D, 2*wdt*D)
            args += [uh, bw]
            in_specs += [pl.BlockSpec(uh.shape, lambda n: (0, 0)),
                         pl.BlockSpec(bw.shape, lambda n: (0, 0))]
            h, wdt = 2 * h, 2 * wdt

    return pl.pallas_call(
        _make_scale_head_kernel(len(convs), upsample),
        out_shape=jax.ShapeDtypeStruct((N, h, wdt * D), feat.dtype),
        grid=(N,),
        in_specs=in_specs,
        out_specs=pl.BlockSpec((1, h, wdt * D), lambda n: (n, 0, 0)),
        compiler_params=pltpu.CompilerParams(dimension_semantics=("parallel",)),
    )(*args)


def predictor_sum(level_flat, pred_w, pred_b, conv_dims):
    """level_flat: list of (N, Hc, Wc*D).  Returns (N, Hc, Wc, K) NHWC."""
    L = len(level_flat)
    N, Hc, WD = level_flat[0].shape
    D = conv_dims
    Wc = WD // D
    K = pred_w.shape[-1]
    w_blk = jnp.kron(jnp.eye(Wc, dtype=pred_w.dtype), pred_w)   # (Wc*D, Wc*K)
    b_flat = jnp.tile(pred_b.reshape(1, K), (1, Wc))            # (1, Wc*K)

    in_specs = [pl.BlockSpec((1, Hc, WD), lambda n: (n, 0, 0)) for _ in range(L)]
    in_specs += [pl.BlockSpec(w_blk.shape, lambda n: (0, 0)),
                 pl.BlockSpec(b_flat.shape, lambda n: (0, 0))]
    out_flat = pl.pallas_call(
        _make_predictor_kernel(L),
        out_shape=jax.ShapeDtypeStruct((N, Hc, Wc * K), level_flat[0].dtype),
        grid=(N,),
        in_specs=in_specs,
        out_specs=pl.BlockSpec((1, Hc, Wc * K), lambda n: (n, 0, 0)),
        compiler_params=pltpu.CompilerParams(dimension_semantics=("parallel",)),
    )(*level_flat, w_blk, b_flat)
    return out_flat.reshape(N, Hc, Wc, K)                # back to NHWC (free)


def decoder_forward(features, heads, pred_w, pred_b):
    """features: list of NHWC tensors, one per FPN level (same order as heads)."""
    first_conv_w = heads[0][0][0][0]
    conv_dims = first_conv_w.shape[-1]
    level_flat = [scale_head_level(feat, convs, upsample, conv_dims)
                  for feat, (convs, upsample) in zip(features, heads)]
    return predictor_sum(level_flat, pred_w, pred_b, conv_dims)


# ----------------------------------------------------------------------------
# Parameters (deterministic, c2_msra_fill-style init) and pure-JAX reference.
# ----------------------------------------------------------------------------
def make_decoder_params(key, feature_channels, feature_strides, conv_dims,
                        num_classes, common_stride):
    heads = []
    for ch, stride in zip(feature_channels, feature_strides):
        head_len = max(1, int(np.log2(stride) - np.log2(common_stride)))
        convs = []
        for k in range(head_len):
            cin = ch if k == 0 else conv_dims
            key, k1 = jax.random.split(key)
            fan_out = conv_dims * 3 * 3
            w = jax.random.normal(k1, (3, 3, cin, conv_dims),
                                  jnp.float32) * np.sqrt(2.0 / fan_out)
            b = jnp.zeros((conv_dims,), jnp.float32)
            convs.append((w, b))
        heads.append((convs, stride != common_stride))
    key, k1 = jax.random.split(key)
    pred_w = jax.random.normal(k1, (conv_dims, num_classes),
                               jnp.float32) * np.sqrt(2.0 / num_classes)
    pred_b = jnp.zeros((num_classes,), jnp.float32)
    return heads, pred_w, pred_b


def _upsample2x_ref(x):
    """NHWC x2 bilinear upsample, align_corners=False (PyTorch semantics)."""
    def up_axis(a, axis):
        size = a.shape[axis]
        prev = jnp.concatenate([lax.slice_in_dim(a, 0, 1, axis=axis),
                                lax.slice_in_dim(a, 0, size - 1, axis=axis)], axis=axis)
        nxt = jnp.concatenate([lax.slice_in_dim(a, 1, size, axis=axis),
                               lax.slice_in_dim(a, size - 1, size, axis=axis)], axis=axis)
        even = 0.25 * prev + 0.75 * a
        odd = 0.75 * a + 0.25 * nxt
        stacked = jnp.stack([even, odd], axis=axis + 1)
        shp = list(a.shape)
        shp[axis] = 2 * size
        return stacked.reshape(shp)
    return up_axis(up_axis(x, 1), 2)


def decoder_forward_reference(features, heads, pred_w, pred_b):
    x = None
    for feat, (convs, upsample) in zip(features, heads):
        y = feat
        for (w, b) in convs:
            y = lax.conv_general_dilated(
                y, w, window_strides=(1, 1), padding="SAME",
                dimension_numbers=("NHWC", "HWIO", "NHWC"),
                precision=lax.Precision.HIGHEST)
            y = jnp.maximum(y + b.reshape(1, 1, 1, -1), 0.0)
            if upsample:
                y = _upsample2x_ref(y)
        x = y if x is None else x + y
    return jnp.einsum("nhwc,ck->nhwk", x, pred_w,
                      precision=lax.Precision.HIGHEST) + pred_b.reshape(1, 1, 1, -1)


# ----------------------------------------------------------------------------
if __name__ == "__main__":
    key = jax.random.PRNGKey(0)

    # Small synthetic config consistent with the module.
    N = 2
    feature_strides = [4, 8, 16, 32]
    feature_channels = [8, 8, 8, 8]
    common_stride = 4
    conv_dims = 16
    num_classes = 8
    H_common, W_common = 16, 16          # resolution at common_stride

    feats = []
    for ch, s in zip(feature_channels, feature_strides):
        key, k1 = jax.random.split(key)
        h = H_common * common_stride // s
        w = W_common * common_stride // s
        feats.append(jax.random.normal(k1, (N, h, w, ch), jnp.float32))

    key, kparams = jax.random.split(key)
    heads, pred_w, pred_b = make_decoder_params(
        kparams, feature_channels, feature_strides, conv_dims,
        num_classes, common_stride)

    out = decoder_forward(feats, heads, pred_w, pred_b)
    out = jax.block_until_ready(out)

    assert out.shape == (N, H_common, W_common, num_classes), out.shape
    assert bool(jnp.all(jnp.isfinite(out)))

    # Numerical check against a pure-JAX reference of the same forward pass.
    ref = decoder_forward_reference(feats, heads, pred_w, pred_b)
    err = float(jnp.max(jnp.abs(out - ref)))
    assert err < 2e-3, f"max abs error vs reference: {err}"

    print("KERNEL_OK")
</pallas_src>

<mosaic_0001>
module attributes {stable_mosaic.version = 11 : i64} {
  func.func @kernel(%arg0: i32, %arg1: memref<1x16x128xf32, #tpu.memory_space<vmem>>, %arg2: memref<3x128x256xf32, #tpu.memory_space<vmem>>, %arg3: memref<2x16x16xf32, #tpu.memory_space<vmem>>, %arg4: memref<1x256xf32, #tpu.memory_space<vmem>>, %arg5: memref<1x16x256xf32, #tpu.memory_space<vmem>>) attributes {dimension_semantics = [#tpu.dimension_semantics<parallel>], iteration_bounds = array<i64: 2>, scalar_prefetch = 0 : i64, scratch_operands = 0 : i64, tpu.core_type = #tpu.core_type<tc>, window_params = [{transform_indices = @transform_0, window_bounds = array<i64: 1, 16, 128>}, {pipeline_mode = #tpu.pipeline_mode<synchronous>, transform_indices = @transform_1, window_bounds = array<i64: 3, 128, 256>}, {pipeline_mode = #tpu.pipeline_mode<synchronous>, transform_indices = @transform_2, window_bounds = array<i64: 2, 16, 16>}, {pipeline_mode = #tpu.pipeline_mode<synchronous>, transform_indices = @transform_3, window_bounds = array<i64: 1, 256>}, {transform_indices = @transform_4, window_bounds = array<i64: 1, 16, 256>}]} {
    %c0 = arith.constant 0 : index
    %c0_0 = arith.constant 0 : index
    %c0_1 = arith.constant 0 : index
    %0 = vector.load %arg1[%c0, %c0_0, %c0_1] : memref<1x16x128xf32, #tpu.memory_space<vmem>>, vector<1x16x128xf32>
    %1 = vector.shape_cast %0 : vector<1x16x128xf32> to vector<16x128xf32>
    %c0_2 = arith.constant 0 : index
    %c0_3 = arith.constant 0 : index
    %c0_4 = arith.constant 0 : index
    %2 = vector.load %arg2[%c0_2, %c0_3, %c0_4] : memref<3x128x256xf32, #tpu.memory_space<vmem>>, vector<1x128x256xf32>
    %3 = vector.shape_cast %2 : vector<1x128x256xf32> to vector<128x256xf32>
    %cst = arith.constant dense<0.000000e+00> : vector<16x256xf32>
    %4 = tpu.matmul %1, %3, %cst {dimension_numbers = #tpu.dot_dimension_numbers<[1], [0], [0], [1], [0, 0, 1, 1], [], []>} : vector<16x128xf32>, vector<128x256xf32>, vector<16x256xf32> -> vector<16x256xf32>
    %c1 = arith.constant 1 : index
    %c0_5 = arith.constant 0 : index
    %c0_6 = arith.constant 0 : index
    %5 = vector.load %arg2[%c1, %c0_5, %c0_6] : memref<3x128x256xf32, #tpu.memory_space<vmem>>, vector<1x128x256xf32>
    %6 = vector.shape_cast %5 : vector<1x128x256xf32> to vector<128x256xf32>
    %cst_7 = arith.constant dense<0.000000e+00> : vector<16x256xf32>
    %7 = tpu.matmul %1, %6, %cst_7 {dimension_numbers = #tpu.dot_dimension_numbers<[1], [0], [0], [1], [0, 0, 1, 1], [], []>} : vector<16x128xf32>, vector<128x256xf32>, vector<16x256xf32> -> vector<16x256xf32>
    %c2 = arith.constant 2 : index
    %c0_8 = arith.constant 0 : index
    %c0_9 = arith.constant 0 : index
    %8 = vector.load %arg2[%c2, %c0_8, %c0_9] : memref<3x128x256xf32, #tpu.memory_space<vmem>>, vector<1x128x256xf32>
    %9 = vector.shape_cast %8 : vector<1x128x256xf32> to vector<128x256xf32>
    %cst_10 = arith.constant dense<0.000000e+00> : vector<16x256xf32>
    %10 = tpu.matmul %1, %9, %cst_10 {dimension_numbers = #tpu.dot_dimension_numbers<[1], [0], [0], [1], [0, 0, 1, 1], [], []>} : vector<16x128xf32>, vector<128x256xf32>, vector<16x256xf32> -> vector<16x256xf32>
    %c0_11 = arith.constant 0 : index
    %c0_12 = arith.constant 0 : index
    %c0_13 = arith.constant 0 : index
    %11 = vector.load %arg3[%c0_11, %c0_12, %c0_13] : memref<2x16x16xf32, #tpu.memory_space<vmem>>, vector<1x16x16xf32>
    %12 = vector.shape_cast %11 : vector<1x16x16xf32> to vector<16x16xf32>
    %cst_14 = arith.constant dense<0.000000e+00> : vector<16x256xf32>
    %13 = tpu.matmul %12, %4, %cst_14 {dimension_numbers = #tpu.dot_dimension_numbers<[1], [0], [0], [1], [0, 0, 1, 1], [], []>} : vector<16x16xf32>, vector<16x256xf32>, vector<16x256xf32> -> vector<16x256xf32>
    %14 = arith.addf %13, %7 : vector<16x256xf32>
    %c1_15 = arith.constant 1 : index
    %c0_16 = arith.constant 0 : index
    %c0_17 = arith.constant 0 : index
    %15 = vector.load %arg3[%c1_15, %c0_16, %c0_17] : memref<2x16x16xf32, #tpu.memory_space<vmem>>, vector<1x16x16xf32>
    %16 = vector.shape_cast %15 : vector<1x16x16xf32> to vector<16x16xf32>
    %cst_18 = arith.constant dense<0.000000e+00> : vector<16x256xf32>
    %17 = tpu.matmul %16, %10, %cst_18 {dimension_numbers = #tpu.dot_dimension_numbers<[1], [0], [0], [1], [0, 0, 1, 1], [], []>} : vector<16x16xf32>, vector<16x256xf32>, vector<16x256xf32> -> vector<16x256xf32>
    %18 = arith.addf %14, %17 : vector<16x256xf32>
    %c0_19 = arith.constant 0 : index
    %c0_20 = arith.constant 0 : index
    %19 = vector.load %arg4[%c0_19, %c0_20] : memref<1x256xf32, #tpu.memory_space<vmem>>, vector<1x256xf32>
    %20 = vector.broadcast %19 : vector<1x256xf32> to vector<16x256xf32>
    %21 = arith.addf %18, %20 : vector<16x256xf32>
    %cst_21 = arith.constant 0.000000e+00 : f32
    %22 = vector.broadcast %cst_21 : f32 to vector<16x256xf32>
    %23 = arith.maximumf %21, %22 : vector<16x256xf32>
    %c0_22 = arith.constant 0 : index
    %c0_23 = arith.constant 0 : index
    %c0_24 = arith.constant 0 : index
    %24 = vector.load %arg5[%c0_22, %c0_23, %c0_24] : memref<1x16x256xf32, #tpu.memory_space<vmem>>, vector<1x16x256xf32>
    %25 = vector.shape_cast %24 : vector<1x16x256xf32> to vector<16x256xf32>
    %26 = vector.shape_cast %23 : vector<16x256xf32> to vector<1x16x256xf32>
    tpu.vector_store %arg5[%c0_22, %c0_23, %c0_24], %26 {strides = array<i32>} : memref<1x16x256xf32, #tpu.memory_space<vmem>>, vector<1x16x256xf32>,
    return
  }
  func.func @transform_0(%arg0: i32) -> (i32, i32, i32) {
    %c0_i32 = arith.constant 0 : i32
    %c0_i32_0 = arith.constant 0 : i32
    %c0_i32_1 = arith.constant 0 : i32
    return %arg0, %c0_i32, %c0_i32_0 : i32, i32, i32
  }
  func.func @transform_1(%arg0: i32) -> (i32, i32, i32) {
    %c0_i32 = arith.constant 0 : i32
    %c0_i32_0 = arith.constant 0 : i32
    %c0_i32_1 = arith.constant 0 : i32
    %c0_i32_2 = arith.constant 0 : i32
    return %c0_i32, %c0_i32_0, %c0_i32_1 : i32, i32, i32
  }
  func.func @transform_2(%arg0: i32) -> (i32, i32, i32) {
    %c0_i32 = arith.constant 0 : i32
    %c0_i32_0 = arith.constant 0 : i32
    %c0_i32_1 = arith.constant 0 : i32
    %c0_i32_2 = arith.constant 0 : i32
    return %c0_i32, %c0_i32_0, %c0_i32_1 : i32, i32, i32
  }
  func.func @transform_3(%arg0: i32) -> (i32, i32) {
    %c0_i32 = arith.constant 0 : i32
    %c0_i32_0 = arith.constant 0 : i32
    %c0_i32_1 = arith.constant 0 : i32
    return %c0_i32, %c0_i32_0 : i32, i32
  }
  func.func @transform_4(%arg0: i32) -> (i32, i32, i32) {
    %c0_i32 = arith.constant 0 : i32
    %c0_i32_0 = arith.constant 0 : i32
    %c0_i32_1 = arith.constant 0 : i32
    return %arg0, %c0_i32, %c0_i32_0 : i32, i32, i32
  }
}

</mosaic_0001>

<bundles_post_ra>
// kernel: tpu_custom_call.1
= control target key start
LH: loop header
LB: loop body
LE: loop exit
PB: predicated region body
PF: predicated region fallthrough
CT: control target
= control target key end

     0   :  { %9 = vsyncpa [#allocation3], 0  ;;  %s1558_s0 = inlined_call_operand.hbm [shape: f32[2,16,128], index: 0, kind: input, shape index: {}]   ;;  %s1559_s1 = inlined_call_operand.hbm [shape: f32[3,128,256], index: 1, kind: input, shape index: {}]   ;;  %s1560_s2 = inlined_call_operand.hbm [shape: f32[2,16,16], index: 2, kind: input, shape index: {}]   ;;  %s1561_s3 = inlined_call_operand.vmem [shape: f32[1,256], index: 3, kind: input, shape index: {}]   ;;  %s1562_s4 = inlined_call_operand.hbm [shape: f32[2,16,256], index: 4, kind: output, shape index: {}]  }
   0x1   :  { %11 = vsyncpa [#allocation3 + $0x1], 0 }
   0x2   :  { %12 = vsyncpa [#allocation6], 0 }
   0x3   :  { %13 = vsyncpa [#allocation4], 0 }
   0x4   :  { %15 = vsyncpa [#allocation4 + $0x1], 0  ;;  %s1286_s15 = smov 0   ;;  %s1288_s16 = smov 0  }
   0x5   :  { %s1290_s17 = smov 0   ;;  %s1292_s18 = smov 0  }
   0x6 LB: > { %s1307_s19 = sadd.s32 4294967295, %s1248_s18   ;;  %s882_s20 = sadd.s32 4294967294, %s1248_s18   ;;  %s1248_s18 = sphi %s1292_s18, %s1582_s18   ;;  %s1244_s17 = sphi %s1290_s17, %s1581_s17   ;;  %s1240_s16 = sphi %s1288_s16, %s1580_s16   ;;  %s1236_s15 = sphi %s1286_s15, %s1579_s15  }
   0x7   : > { %p41_p0 = scmp.ne.s32.totalorder %s1240_s16, %s1236_s15  ;;  %p1563_p1 = scmp.eq.s32.totalorder %s1307_s19, 0 }
   0x8   : > { %p134_p3 = scmp.eq.s32.totalorder %s882_s20, 1  ;;  %p883_p5 = scmp.ge.s32.totalorder %s1248_s18, 1 }
   0x9   : > { %p1316_p4 = por %p1563_p1, %p41_p0  ;;  %p141_p7 = scmp.lt.s32.totalorder %s1248_s18, 3 }
   0xa   : > { %p1321_p6 = por %p134_p3, %p41_p0  ;;  %s1250_s24 = smov [#allocation5]  }
   0xb   : > { %s1566_s21 = scalar_select %p1316_p4, 1, 0 }
   0xc   : > { %s1567_s22 = scalar_select %p1321_p6, 1, 0 }
   0xd   : > { %p1326_p8 = pnand %p883_p5, %p141_p7  ;;  %s153_s25 = sshll.u32 %s1250_s24, 4  ;;  %s1330_s25 = int_to_ptr.vmem [resolvable:$true] %s153_s25 }
   0xe   : > { %s1251_s27 = smov [#allocation7]   ;;  %s1092_s5 = scalar_lea.hbm %s1559_s1, 12288 }
   0xf   : > { %p1030_p9 = pneg %p1326_p8  ;;  %s166_s28 = sshll.u32 %s1251_s27, 4  ;;  %s1341_s28 = int_to_ptr.vmem [resolvable:$true] %s166_s28 }
  0x10   : > { %p1093_p12 = scmp.ne.s32.totalorder %s1559_s1, %s1092_s5  ;;  %p1099_p5 = scmp.lt.u32.totalorder %s1092_s5, %s1559_s1 }
  0x11   : > { %p1337_p11 = pnand %p1030_p9, %p1563_p1 }
  0x13   : > { %p1094_p13 = pneg %p1337_p11 }
  0x15   : > { %p1095_p0 = pnand %p1094_p13, %p1093_p12 }
  0x17   : > { %p1096_p3 = pneg %p1095_p0 }
  0x19   : > { %p1101_p7 = pnand %p1099_p5, %p1096_p3 }
  0x1b   : > { %1104 = shalt.err (!%p1101_p7)
}
  0x1c   : > { %s1105_s10 = scalar_lea.vmem %s1330_s25, 12288  ;;  %p1113_p2 = scmp.lt.s32.totalorder %s1330_s25, %s1330_s25 }
  0x1d   : > { %p1106_p9 = scmp.ne.s32.totalorder %s1330_s25, %s1105_s10  ;;  %p1114_p12 = scmp.lt.s32.totalorder %s1105_s10, %s1105_s10 }
  0x1f   : > { %p1108_p10 = pnand %p1106_p9, %p1094_p13  ;;  %p1115_p0 = por %p1114_p12, %p1113_p2 }
  0x21   : > { %p1109_p1 = pneg %p1108_p10 }
  0x23   : > { %p1116_p6 = pnand %p1115_p0, %p1109_p1 }
  0x25   : > { %1119 = shalt.err (!%p1116_p6)
}
  0x26   : > { %s1252_s11 = smov 256   ;;  %s1253_s12 = smov 16  }
  0x27   : > { %1033 = dma.hbm_to_vmem [thread:$0]  (!%p1337_p11), %s1559_s1, 12288, %s1330_s25, [#allocation6], %s1252_s11, %s1252_s11, %s1253_s12  }
  0x28   : > { %s1120_s27 = scalar_lea.hbm %s1560_s2, 512 }
  0x29   : > { %p1121_p2 = scmp.ne.s32.totalorder %s1560_s2, %s1120_s27  ;;  %p1127_p10 = scmp.lt.u32.totalorder %s1120_s27, %s1560_s2 }
  0x2b   : > { %p1123_p1 = pnand %p1121_p2, %p1094_p13 }
  0x2d   : > { %p1124_p6 = pneg %p1123_p1 }
  0x2f   : > { %p1129_p3 = pnand %p1127_p10, %p1124_p6 }
  0x31   : > { %1132 = shalt.err (!%p1129_p3)
}
  0x32   : > { %s1133_s25 = scalar_lea.vmem %s1341_s28, 512  ;;  %p1141_p12 = scmp.lt.s32.totalorder %s1341_s28, %s1341_s28 }
  0x33   : > { %p1134_p5 = scmp.ne.s32.totalorder %s1341_s28, %s1133_s25  ;;  %p1142_p0 = scmp.lt.s32.totalorder %s1133_s25, %s1133_s25 }
  0x35   : > { %p1136_p7 = pnand %p1134_p5, %p1094_p13  ;;  %p1143_p2 = por %p1142_p0, %p1141_p12 }
  0x37   : > { %p1137_p9 = pneg %p1136_p7 }
  0x39   : > { %p1144_p1 = pnand %p1143_p2, %p1137_p9 }
  0x3b   : > { %1147 = shalt.err (!%p1144_p1)
}
  0x3c   : > { %s1254_s7 = smov 128   ;;  %s1255_s8 = smov 8  }
  0x3d   : > { %1036 = dma.hbm_to_vmem [thread:$0]  (!%p1337_p11), %s1560_s2, 512, %s1341_s28, [#allocation6], %s1254_s7, %s1254_s7, %s1255_s8  }
  0x3e   : > { %s1399_s11 = sadd.s32 1, %s1248_s18   ;;  %s28_s13 = sadd.s32 1, %s1244_s17 }
  0x3f   : > { %s25_s12 = ssub.s32 %s1248_s18, %s1399_s11  ;;  %p35_p6 = scmp.ne.s32.totalorder %s1244_s17, %s1240_s16 }
  0x40   : > { %p26_p13 = scmp.eq.s32.totalorder %s25_s12, 0  ;;  %p36_p10 = scmp.eq.s32.totalorder %s1248_s18, 0 }
  0x41   : > { %p1570_p5 = scmp.eq.s32.totalorder %s1307_s19, 1  ;;  %p1047_p9 = scmp.lt.s32.totalorder %s1248_s18, 2 }
  0x42   : > { %s1408_s14 = scalar_select %p26_p13, %s1244_s17, %s28_s13  }
  0x43   : > { %p37_p3 = por %p36_p10, %p35_p6  ;;  %p1412_p7 = por %p1570_p5, %p35_p6 }
  0x44   : > { %s183_s20 = sand.u32 1, %s1244_s17   ;;  %s904_s28 = sshll.u32 %s1248_s18, 8 }
  0x45   : > { %s1571_s26 = scalar_select %p1412_p7, 1, 0 }
  0x46   : > { %s887_s24 = sshll.u32 %s183_s20, 4  ;;  %s1422_s30 = scalar_lea.hbm %s1558_s0, %s904_s28 }
  0x47   : > { %s187_s5 = scalar_lea.vmem [#allocation2], %s887_s24  ;;  %p1426_p11 = pnand %p1047_p9, %p37_p3 }
  0x48   : > { %s194_s6 = sshll.u32 %s187_s5, 4  ;;  %s1430_s9 = scalar_lea.sflag [#allocation3], %s183_s20  ;;  %s1424_s6 = int_to_ptr.vmem [resolvable:$true] %s194_s6 }
  0x49   : > { %s1148_s10 = scalar_lea.hbm %s1422_s30, 256  ;;  %p1150_p0 = pneg %p1426_p11 }
  0x4a   : > { %p1149_p12 = scmp.ne.s32.totalorder %s1422_s30, %s1148_s10  ;;  %s1153_s24 = scalar_lea.hbm %s1558_s0, 512 }
  0x4b   : > { %p1154_p13 = scmp.lt.u32.totalorder %s1422_s30, %s1558_s0  ;;  %p1155_p6 = scmp.lt.u32.totalorder %s1153_s24, %s1148_s10 }
  0x4c   : > { %p1151_p2 = pnand %p1150_p0, %p1149_p12  ;;  %p1157_p3 = scmp.lt.u32.totalorder %s1148_s10, %s1422_s30 }
  0x4d   : > { %p1156_p10 = por %p1155_p6, %p1154_p13 }
  0x4e   : > { %p1152_p1 = pneg %p1151_p2 }
  0x4f   : > { %p1158_p5 = por %p1157_p3, %p1156_p10 }
  0x51   : > { %p1159_p9 = pnand %p1158_p5, %p1152_p1 }
  0x53   : > { %1162 = shalt.err (!%p1159_p9)
}
  0x54   : > { %s1163_s20 = scalar_lea.vmem %s1424_s6, 256  ;;  %s1256_s29 = smov [#allocation2]  }
  0x55   : > { %p1164_p12 = scmp.ne.s32.totalorder %s1424_s6, %s1163_s20  ;;  %s1168_s5 = sshll.u32 %s1256_s29, 4  ;;  %s1169_s5 = int_to_ptr.vmem [resolvable:$false] %s1168_s5 }
  0x56   : > { %s1170_s12 = scalar_lea.vmem %s1169_s5, 512  ;;  %p1171_p4 = scmp.lt.s32.totalorder %s1424_s6, %s1169_s5 }
  0x57   : > { %p1166_p2 = pnand %p1164_p12, %p1150_p0  ;;  %p1172_p13 = scmp.lt.s32.totalorder %s1170_s12, %s1163_s20 }
  0x59   : > { %p1167_p7 = pneg %p1166_p2  ;;  %p1173_p6 = por %p1172_p13, %p1171_p4 }
  0x5b   : > { %p1174_p10 = pnand %p1173_p6, %p1167_p7 }
  0x5d   : > { %1177 = shalt.err (!%p1174_p10)
}
  0x5e   : > { %1040 = dma.hbm_to_vmem [thread:$0]  (!%p1426_p11), %s1422_s30, 256, %s1424_s6, %s1430_s9, %s1254_s7, %s1254_s7, %s1255_s8  }
  0x5f   : > { %206 = sbr.rel (%p1326_p8) target bundleno = 632 (0x278), region = 36  ;;  %s1464_s10 = sand.u32 (!%p1326_p8), 1, %s1240_s16  }
  0x60   : > { %s891_s13 = sshll.u32 (!%p1326_p8), %s1464_s10, 4  ;;  %s209_s24 = scalar_lea.sflag (!%p1326_p8), [#allocation3], %s1464_s10 }
  0x61   : > { %s1468_s28 = scalar_lea.vmem (!%p1326_p8), [#allocation2], %s891_s13  ;;  %p1573_p4 = scmp.ne.s32.totalorder (!%p1326_p8), %s1566_s21, 0 }
  0x66   : > { %1223 = dma.done.wait (%p1573_p4), %s209_s24, 256  }
  0x67   : > { %1225 = vsyncadd (%p1573_p4), %s209_s24, 4294967040  ;;  %p1574_p7 = scmp.eq.s32.totalorder %s1307_s19, 0 }
  0x69   : > { %1227 = dma.done.wait (%p1574_p7), [#allocation6], 12800   ;;  %p1575_p8 = pmov %p1574_p7 }
  0x6a   : > { %v1257_v0 = vmov 0.0   ;;  %v248_v1 = vld [vmem:[#allocation5 + $0x8] sm:$0xff]  ;;  %v250_v2 = vld [vmem:[#allocation5 + $0x18] sm:$0xff]  ;;  %v247_v3 = vld [vmem:[#allocation5] sm:$0xff]  ;;  %vm578_vm0 = vcmask 130048   ;;  %s894_s7 = sshll.u32 %s1464_s10, 5 }
  0x6b   : > { %1229 = vsyncadd (%p1575_p8), [#allocation6], 4294954496  ;;  %343 = vmatprep.mubr.f32.mxu0 %v1257_v0  ;;  %453 = vmatprep.mubr.f32.mxu1 %v1257_v0  ;;  %v906_v4 = vpack.c.bf16 %v250_v2, %v248_v1  ;;  %v249_v5 = vld [vmem:[#allocation5 + $0x10] sm:$0xff]  ;;  %v252_v6 = vld [vmem:[#allocation5 + $0x28] sm:$0xff]  ;;  %s244_s8 = scalar_lea.vmem [#allocation8], %s894_s7  ;;  %s905_s6 = sshll.u32 %s1307_s19, 9 }
  0x6c   : > { %v254_v7 = vld [vmem:[#allocation5 + $0x38] sm:$0xff]  ;;  %v908_v8 = vpack.c.bf16 %v249_v5, %v247_v3  ;;  %v251_v10 = vld [vmem:[#allocation5 + $0x20] sm:$0xff]  ;;  %v253_v11 = vld [vmem:[#allocation5 + $0x30] sm:$0xff]  ;;  %s790_s30 = sshll.u32 %s244_s8, 4  ;;  %s1514_s27 = scalar_lea.hbm %s1562_s4, %s905_s6  ;;  %s1509_s30 = int_to_ptr.vmem [resolvable:$true] %s790_s30 }
  0x6d   : > { %v910_v9 = vpack.c.bf16 %v254_v7, %v252_v6  ;;  %v256_v12 = vld [vmem:[#allocation5 + $0x48] sm:$0xff]  ;;  %907 = vmatprep.subr.bf16.mxu0 %v906_v4  ;;  %v258_v13 = vld [vmem:[#allocation5 + $0x58] sm:$0xff]  ;;  %v912_v14 = vpack.c.bf16 %v253_v11, %v251_v10  ;;  %v255_v16 = vld [vmem:[#allocation5 + $0x40] sm:$0xff]  ;;  %s777_s19 = scalar_lea.sflag [#allocation4], %s1464_s10  ;;  %s1178_s20 = scalar_lea.vmem %s1509_s30, 512 }
  0x6e   : > { %909 = vmatpush1.bf16.msra.mxu0 %v908_v8  ;;  %v914_v15 = vpack.c.bf16 %v258_v13, %v256_v12  ;;  %v257_v17 = vld [vmem:[#allocation5 + $0x50] sm:$0xff]  ;;  %v260_v18 = vld [vmem:[#allocation5 + $0x68] sm:$0xff]  ;;  %v262_v19 = vld [vmem:[#allocation5 + $0x78] sm:$0xff]  ;;  %p1179_p11 = scmp.ne.s32.totalorder %s1509_s30, %s1178_s20  ;;  %p1576_p0 = scmp.ne.s32.totalorder %s1571_s26, 0 }
  0x6f   : > { %911 = vmatprep.subr.bf16.mxu0 %v910_v9  ;;  %v916_v20 = vpack.c.bf16 %v257_v17, %v255_v16  ;;  %v918_v21 = vpack.c.bf16 %v262_v19, %v260_v18  ;;  %v259_v22 = vld [vmem:[#allocation5 + $0x60] sm:$0xff]  ;;  %v261_v23 = vld [vmem:[#allocation5 + $0x70] sm:$0xff]  ;;  %v264_v24 = vld [vmem:[#allocation5 + $0x88] sm:$0xff]  ;;  %s1258_s29 = smov [#allocation8]  }
  0x70   : > { %v266_v25 = vld [vmem:[#allocation5 + $0x98] sm:$0xff]  ;;  %v920_v26 = vpack.c.bf16 %v261_v23, %v259_v22  ;;  %v263_v28 = vld [vmem:[#allocation5 + $0x80] sm:$0xff]  ;;  %v265_v29 = vld [vmem:[#allocation5 + $0x90] sm:$0xff]  ;;  %p1180_p1 = pnand %p1179_p11, %p1576_p0  ;;  %s1182_s5 = sshll.u32 %s1258_s29, 4  ;;  %s1183_s5 = int_to_ptr.vmem [resolvable:$false] %s1182_s5 }
  0x71   : > { %v922_v27 = vpack.c.bf16 %v266_v25, %v264_v24  ;;  %v268_v30 = vld [vmem:[#allocation5 + $0xa8] sm:$0xff]  ;;  %v270_v31 = vld [vmem:[#allocation5 + $0xb8] sm:$0xff]  ;;  %v924_v32 = vpack.c.bf16 %v265_v29, %v263_v28  ;;  %v267_v34 = vld [vmem:[#allocation5 + $0xa0] sm:$0xff]  ;;  %s1184_s12 = scalar_lea.vmem %s1183_s5, 1024  ;;  %p1185_p5 = scmp.lt.s32.totalorder %s1509_s30, %s1183_s5 }
  0x72   : > { %913 = vmatpush1.bf16.msra.mxu0 %v912_v14  ;;  %v926_v33 = vpack.c.bf16 %v270_v31, %v268_v30  ;;  %v269_v35 = vld [vmem:[#allocation5 + $0xb0] sm:$0xff]  ;;  %v272_v36 = vld [vmem:[#allocation5 + $0xc8] sm:$0xff]  ;;  %v274_v37 = vld [vmem:[#allocation5 + $0xd8] sm:$0xff]  ;;  %p1181_p3 = pneg %p1180_p1  ;;  %p1186_p9 = scmp.lt.s32.totalorder %s1184_s12, %s1178_s20 }
  0x73   : > { %915 = vmatprep.subr.bf16.mxu0 %v914_v15  ;;  %v928_v38 = vpack.c.bf16 %v269_v35, %v267_v34  ;;  %v271_v39 = vld [vmem:[#allocation5 + $0xc0] sm:$0xff]  ;;  %v930_v40 = vpack.c.bf16 %v274_v37, %v272_v36  ;;  %v273_v41 = vld [vmem:[#allocation5 + $0xd0] sm:$0xff]  ;;  %v276_v42 = vld [vmem:[#allocation5 + $0xe8] sm:$0xff] }
  0x74   : > { %v278_v43 = vld [vmem:[#allocation5 + $0xf8] sm:$0xff]  ;;  %v358_v44 = vld [vmem:[#allocation5 + $0x108] sm:$0xff]  ;;  %v357_v46 = vld [vmem:[#allocation5 + $0x100] sm:$0xff]  ;;  %v932_v51 = vpack.c.bf16 %v273_v41, %v271_v39  ;;  %p1187_p12 = por %p1186_p9, %p1185_p5 }
  0x75   : > { %v360_v45 = vld [vmem:[#allocation5 + $0x118] sm:$0xff]  ;;  %v359_v48 = vld [vmem:[#allocation5 + $0x110] sm:$0xff]  ;;  %v362_v49 = vld [vmem:[#allocation5 + $0x128] sm:$0xff]  ;;  %v934_v57 = vpack.c.bf16 %v278_v43, %v276_v42 }
  0x76   : > { %917 = vmatpush1.bf16.msra.mxu0 %v916_v20  ;;  %v938_v47 = vpack.c.bf16 %v360_v45, %v358_v44  ;;  %v364_v50 = vld [vmem:[#allocation5 + $0x138] sm:$0xff]  ;;  %v940_v52 = vpack.c.bf16 %v359_v48, %v357_v46  ;;  %v361_v54 = vld [vmem:[#allocation5 + $0x120] sm:$0xff]  ;;  %v363_v55 = vld [vmem:[#allocation5 + $0x130] sm:$0xff]  ;;  %p1188_p2 = pnand %p1187_p12, %p1181_p3 }
  0x77   : > { %919 = vmatprep.subr.bf16.mxu0 %v918_v21  ;;  %v942_v53 = vpack.c.bf16 %v364_v50, %v362_v49  ;;  %v366_v56 = vld [vmem:[#allocation5 + $0x148] sm:$0xff]  ;;  %v275_v58 = vld [vmem:[#allocation5 + $0xe0] sm:$0xff]  ;;  %v277_v59 = vld [vmem:[#allocation5 + $0xf0] sm:$0xff]  ;;  %v944_v63 = vpack.c.bf16 %v363_v55, %v361_v54 }
  0x78   : > { %939 = vmatprep.subr.bf16.mxu1 %v938_v47  ;;  %v368_v60 = vld [vmem:[#allocation5 + $0x158] sm:$0xff]  ;;  %v468_v61 = vld [vmem:[#allocation5 + $0x208] sm:$0xff]  ;;  %v365_v2 = vld [vmem:[#allocation5 + $0x140] sm:$0xff]  ;;  %v936_v4 = vpack.c.bf16 %v277_v59, %v275_v58 }
  0x79   : > { %v470_v62 = vld [vmem:[#allocation5 + $0x218] sm:$0xff]  ;;  %941 = vmatpush1.bf16.msra.mxu1 %v940_v52  ;;  %v946_v1 = vpack.c.bf16 %v368_v60, %v366_v56  ;;  %v367_v3 = vld [vmem:[#allocation5 + $0x150] sm:$0xff]  ;;  %v370_v5 = vld [vmem:[#allocation5 + $0x168] sm:$0xff] }
  0x7a   : > { %921 = vmatpush1.bf16.msra.mxu0 %v920_v26  ;;  %943 = vmatprep.subr.bf16.mxu1 %v942_v53  ;;  %v372_v6 = vld [vmem:[#allocation5 + $0x178] sm:$0xff]  ;;  %v970_v7 = vpack.c.bf16 %v470_v62, %v468_v61  ;;  %v467_v8 = vld [vmem:[#allocation5 + $0x200] sm:$0xff]  ;;  %v469_v9 = vld [vmem:[#allocation5 + $0x210] sm:$0xff]  ;;  %v948_v12 = vpack.c.bf16 %v367_v3, %v365_v2 }
  0x7b   : > { %923 = vmatprep.subr.bf16.mxu0 %v922_v27  ;;  %v472_v10 = vld [vmem:[#allocation5 + $0x228] sm:$0xff]  ;;  %v474_v11 = vld [vmem:[#allocation5 + $0x238] sm:$0xff]  ;;  %v950_v13 = vpack.c.bf16 %v372_v6, %v370_v5  ;;  %v369_v14 = vld [vmem:[#allocation5 + $0x160] sm:$0xff]  ;;  %v972_v17 = vpack.c.bf16 %v469_v9, %v467_v8 }
  0x7c   : > { %v371_v15 = vld [vmem:[#allocation5 + $0x170] sm:$0xff]  ;;  %v374_v18 = vld [vmem:[#allocation5 + $0x188] sm:$0xff]  ;;  %v376_v19 = vld [vmem:[#allocation5 + $0x198] sm:$0xff]  ;;  %v974_v20 = vpack.c.bf16 %v474_v11, %v472_v10 }
  0x7d   : > { %945 = vmatpush1.bf16.msra.mxu1 %v944_v63  ;;  %v1481_v16 = vld [vmem:[%s1468_s28] sm:$0xff]  ;;  %v476_v23 = vld [vmem:[#allocation5 + $0x248] sm:$0xff]  ;;  %v478_v24 = vld [vmem:[#allocation5 + $0x258] sm:$0xff]  ;;  %v952_v25 = vpack.c.bf16 %v371_v15, %v369_v14  ;;  %v954_v26 = vpack.c.bf16 %v376_v19, %v374_v18 }
  0x7e   : > { %925 = vmatpush1.bf16.msra.mxu0 %v924_v32  ;;  %947 = vmatprep.subr.bf16.mxu1 %v946_v1  ;;  %v471_v21 = vld [vmem:[#allocation5 + $0x220] sm:$0xff]  ;;  %v473_v22 = vld [vmem:[#allocation5 + $0x230] sm:$0xff]  ;;  %v1486_v29 = vld [vmem:[%s1468_s28 + $0x8] sm:$0xff] }
  0x7f   : > { %927 = vmatprep.subr.bf16.mxu0 %v926_v33  ;;  %v373_v27 = vld [vmem:[#allocation5 + $0x180] sm:$0xff]  ;;  %v375_v28 = vld [vmem:[#allocation5 + $0x190] sm:$0xff]  ;;  %v976_v30 = vpack.c.bf16 %v473_v22, %v471_v21  ;;  %v378_v31 = vld [vmem:[#allocation5 + $0x1a8] sm:$0xff]  ;;  %v978_v33 = vpack.c.bf16 %v478_v24, %v476_v23 }
  0x80   : > { %v380_v32 = vld [vmem:[#allocation5 + $0x1b8] sm:$0xff]  ;;  %v475_v34 = vld [vmem:[#allocation5 + $0x240] sm:$0xff]  ;;  %v477_v35 = vld [vmem:[#allocation5 + $0x250] sm:$0xff] }
  0x81   : > { %949 = vmatpush1.bf16.msra.mxu1 %v948_v12  ;;  %v480_v36 = vld [vmem:[#allocation5 + $0x268] sm:$0xff]  ;;  %v482_v37 = vld [vmem:[#allocation5 + $0x278] sm:$0xff]  ;;  %v958_v39 = vpack.c.bf16 %v380_v32, %v378_v31  ;;  %v379_v41 = vld [vmem:[#allocation5 + $0x1b0] sm:$0xff]  ;;  %v980_v42 = vpack.c.bf16 %v477_v35, %v475_v34 }
  0x82   : > { %929 = vmatpush1.bf16.msra.mxu0 %v928_v38  ;;  %951 = vmatprep.subr.bf16.mxu1 %v950_v13  ;;  %v956_v38 = vpack.c.bf16 %v375_v28, %v373_v27  ;;  %v982_v43 = vpack.c.bf16 %v482_v37, %v480_v36  ;;  %v479_v44 = vld [vmem:[#allocation5 + $0x260] sm:$0xff]  ;;  %v481_v45 = vld [vmem:[#allocation5 + $0x270] sm:$0xff]  ;;  %v484_v46 = vld [vmem:[#allocation5 + $0x288] sm:$0xff]  ;;  %v754_v37 = vlaneseq }
  0x83   : > { %931 = vmatprep.subr.bf16.mxu0 %v930_v40  ;;  %v377_v40 = vld [vmem:[#allocation5 + $0x1a0] sm:$0xff]  ;;  %v486_v47 = vld [vmem:[#allocation5 + $0x298] sm:$0xff]  ;;  %v984_v49 = vpack.c.bf16 %v481_v45, %v479_v44  ;;  %v485_v52 = vld [vmem:[#allocation5 + $0x290] sm:$0xff] }
  0x84   : > { %v960_v48 = vpack.c.bf16 %v379_v41, %v377_v40  ;;  %v986_v50 = vpack.c.bf16 %v486_v47, %v484_v46  ;;  %v488_v53 = vld [vmem:[#allocation5 + $0x2a8] sm:$0xff]  ;;  %v490_v54 = vld [vmem:[#allocation5 + $0x2b8] sm:$0xff]  ;;  %v489_v58 = vld [vmem:[#allocation5 + $0x2b0] sm:$0xff] }
  0x85   : > { %953 = vmatpush1.bf16.msra.mxu1 %v952_v25  ;;  %v990_v56 = vpack.c.bf16 %v490_v54, %v488_v53  ;;  %v492_v59 = vld [vmem:[#allocation5 + $0x2c8] sm:$0xff]  ;;  %v494_v60 = vld [vmem:[#allocation5 + $0x2d8] sm:$0xff]  ;;  %v491_v63 = vld [vmem:[#allocation5 + $0x2c0] sm:$0xff] }
  0x86   : > { %933 = vmatpush1.bf16.msra.mxu0 %v932_v51  ;;  %955 = vmatprep.subr.bf16.mxu1 %v954_v26  ;;  %v483_v51 = vld [vmem:[#allocation5 + $0x280] sm:$0xff]  ;;  %v994_v62 = vpack.c.bf16 %v494_v60, %v492_v59  ;;  %v493_v1 = vld [vmem:[#allocation5 + $0x2d0] sm:$0xff]  ;;  %v496_v2 = vld [vmem:[#allocation5 + $0x2e8] sm:$0xff] }
  0x87   : > { %935 = vmatprep.subr.bf16.mxu0 %v934_v57  ;;  %v988_v55 = vpack.c.bf16 %v485_v52, %v483_v51  ;;  %v487_v57 = vld [vmem:[#allocation5 + $0x2a0] sm:$0xff]  ;;  %v498_v3 = vld [vmem:[#allocation5 + $0x2f8] sm:$0xff]  ;;  %v382_v9 = vld [vmem:[#allocation5 + $0x1c8] sm:$0xff] }
  0x88   : > { %v992_v61 = vpack.c.bf16 %v489_v58, %v487_v57  ;;  %v998_v5 = vpack.c.bf16 %v498_v3, %v496_v2  ;;  %v495_v6 = vld [vmem:[#allocation5 + $0x2e0] sm:$0xff]  ;;  %v384_v10 = vld [vmem:[#allocation5 + $0x1d8] sm:$0xff]  ;;  %v383_v13 = vld [vmem:[#allocation5 + $0x1d0] sm:$0xff] }
  0x89   : > { %957 = vmatpush1.bf16.msra.mxu1 %v956_v38  ;;  %v962_v11 = vpack.c.bf16 %v384_v10, %v382_v9  ;;  %v381_v12 = vld [vmem:[#allocation5 + $0x1c0] sm:$0xff]  ;;  %v386_v15 = vld [vmem:[#allocation5 + $0x1e8] sm:$0xff]  ;;  %v663_v35 = vld [vmem:[#allocation7 + $0x10] sm:$0xff]  ;;  %v755_v38 = vshrl.u32 %v754_v37, 7 }
  0x8a   : > { %937 = vmatpush1.bf16.msra.mxu0 %v936_v4  ;;  %959 = vmatprep.subr.bf16.mxu1 %v958_v39  ;;  %v996_v4 = vpack.c.bf16 %v493_v1, %v491_v63  ;;  %v964_v14 = vpack.c.bf16 %v383_v13, %v381_v12  ;;  %v385_v19 = vld [vmem:[#allocation5 + $0x1e0] sm:$0xff]  ;;  %v664_v36 = vld [vmem:[#allocation7 + $0x18] sm:$0xff] }
  0x8b   : > { %971 = vmatprep.subr.bf16.mxu0 %v970_v7  ;;  %v497_v7 = vld [vmem:[#allocation5 + $0x2f0] sm:$0xff]  ;;  %v576_v28 = vld [vmem:[#allocation7] sm:$0xff]  ;;  %v756_v39 = vsub.s32 0, %v755_v38  ;;  %v760_v41 = vsub.s32 1, %v755_v38 }
  0x8c   : > { %v1000_v8 = vpack.c.bf16 %v497_v7, %v495_v6  ;;  %v752_v40 = vld [vmem:[%s1561_s3] sm:$0x3] }
  0x8d   : > { %344 = vmatmul.mubr.f32.vlgmr.msra.gmra.mrb[0].mxu0 %v1481_v16  ;;  %961 = vmatpush1.bf16.msra.mxu1 %v960_v48 }
  0x8e   : > { %973 = vmatpush1.bf16.msra.mxu0 %v972_v17  ;;  %349 = vmatprep.mubr.f32.mxu0 %v1257_v0  ;;  %v388_v17 = vld [vmem:[#allocation5 + $0x1f8] sm:$0xff] }
  0x8f   : > { %975 = vmatprep.subr.bf16.mxu0 %v974_v20  ;;  %963 = vmatprep.subr.bf16.mxu1 %v962_v11  ;;  %v966_v18 = vpack.c.bf16 %v388_v17, %v386_v15  ;;  %v387_v20 = vld [vmem:[#allocation5 + $0x1f0] sm:$0xff] }
  0x90   : > { %v968_v21 = vpack.c.bf16 %v387_v20, %v385_v19 }
  0x91   : > { %350 = vmatmul.mubr.f32.gmra.mrb[2].mxu0 %v1486_v29  ;;  %965 = vmatpush1.bf16.msra.mxu1 %v964_v14 }
  0x92   : > { %977 = vmatpush1.bf16.msra.mxu0 %v976_v30  ;;  %563 = vmatprep.mubr.f32.mxu0 %v1257_v0 }
  0x93   : > { %979 = vmatprep.subr.bf16.mxu0 %v978_v33  ;;  %967 = vmatprep.subr.bf16.mxu1 %v966_v18 }
  0x95   : > { %969 = vmatpush1.bf16.msra.mxu1 %v968_v21 }
  0x96   : > { %981 = vmatpush1.bf16.msra.mxu0 %v980_v42  ;;  %v757_v42 = vrot.slane %v752_v40, %v756_v39 }
  0x97   : > { %983 = vmatprep.subr.bf16.mxu0 %v982_v43  ;;  %v761_v43 = vrot.slane %v752_v40, %v760_v41 }
  0x98   : > { %454 = vmatmul.mubr.f32.vlgmr.msra.gmra.mrb[0].mxu1 %v1481_v16 }
  0x99   : > { %459 = vmatprep.mubr.f32.mxu1 %v1257_v0 }
  0x9a   : > { %985 = vmatpush1.bf16.msra.mxu0 %v984_v49 }
  0x9b   : > { %987 = vmatprep.subr.bf16.mxu0 %v986_v50 }
  0x9c   : > { %460 = vmatmul.mubr.f32.gmra.mrb[2].mxu1 %v1486_v29 }
  0x9d   : > { %649 = vmatprep.mubr.f32.mxu1 %v1257_v0 }
  0x9e   : > { %989 = vmatpush1.bf16.msra.mxu0 %v988_v55 }
  0x9f   : > { %991 = vmatprep.subr.bf16.mxu0 %v990_v56 }
  0xa2   : > { %993 = vmatpush1.bf16.msra.mxu0 %v992_v61 }
  0xa3   : > { %995 = vmatprep.subr.bf16.mxu0 %v994_v62 }
  0xa6   : > { %997 = vmatpush1.bf16.msra.mxu0 %v996_v4 }
  0xa7   : > { %999 = vmatprep.subr.bf16.mxu0 %v998_v5 }
  0xaa   : > { %1001 = vmatpush1.bf16.msra.mxu0 %v1000_v8 }
  0xad   : > { %564 = vmatmul.mubr.f32.vlgmr.msra.gmra.mrb[4].mxu0 %v1481_v16  ;;  %v577_v16 = vld [vmem:[#allocation7 + $0x8] sm:$0xff] }
  0xae   : > { %569 = vmatprep.mubr.f32.mxu0 %v1257_v0 }
  0xb1   : > { %570 = vmatmul.mubr.f32.gmra.mrb[6].mxu0 %v1486_v29 }
 0x160   : > { %v345_v22 = vpop.f32.mrb[0].mxu0 }
 0x161   : > { %v347_v23 = vpop.f32.mrb[1].mxu0 }
 0x164   : > { %v351_v24 = vpop.f32.mrb[2].mxu0 }
 0x165   : > { %v1004_v25 = vpack.c.bf16 %v351_v24, %v345_v22  ;;  %v353_v26 = vpop.f32.mrb[3].mxu0 }
 0x166   : > { %v1002_v27 = vpack.c.bf16 %v353_v26, %v347_v23 }
 0x168   : > { %1003 = vmatprep.subr.bf16.mxu1 %v1002_v27 }
 0x169   : > { %1005 = vmatpush1.bf16.msra.mxu1 %v1004_v25 }
 0x16c   : > { %895 = vmatmul.mubr.msk.f32.vlgmr.msra.gmra.mrb[0].mxu1 %vm578_vm0, %v576_v28 }
 0x16d   : > { %655 = vmatprep.mubr.f32.mxu1 %v1257_v0 }
 0x170   : > { %896 = vmatmul.mubr.msk.f32.gmra.mrb[2].mxu1 %vm578_vm0, %v577_v16 }
 0x171   : > { %735 = vmatprep.mubr.f32.mxu1 %v1257_v0 }
 0x180   : > { %v565_v29 = vpop.f32.mrb[4].mxu0 }
 0x181   : > { %v567_v30 = vpop.f32.mrb[5].mxu0 }
 0x184   : > { %v571_v31 = vpop.f32.mrb[6].mxu0 }
 0x185   : > { %v1008_v32 = vpack.c.bf16 %v571_v31, %v565_v29  ;;  %v573_v33 = vpop.f32.mrb[7].mxu0 }
 0x186   : > { %v1006_v34 = vpack.c.bf16 %v573_v33, %v567_v30 }
 0x188   : > { %1007 = vmatprep.subr.bf16.mxu1 %v1006_v34 }
 0x189   : > { %1009 = vmatpush1.bf16.msra.mxu1 %v1008_v32 }
 0x18c   : > { %897 = vmatmul.mubr.msk.f32.vlgmr.msra.gmra.mrb[0].mxu1 %vm578_vm0, %v663_v35 }
 0x18d   : > { %741 = vmatprep.mubr.f32.mxu1 %v1257_v0 }
 0x190   : > { %898 = vmatmul.mubr.msk.f32.gmra.mrb[2].mxu1 %vm578_vm0, %v664_v36 }
 0x25f   : > { %v737_v44 = vpop.f32.mrb[0].mxu1 }
 0x260   : > { %v764_v45 = vadd.f32 %v757_v42, %v737_v44  ;;  %v739_v46 = vpop.f32.mrb[1].mxu1 }
 0x261   : > { %v765_v47 = vadd.f32 %v761_v43, %v739_v46 }
 0x262   : > { %v768_v0 = vmax.f32 %v764_v45, 0.0 }
 0x263   : > { %v769_v48 = vmax.f32 %v765_v47, 0.0  ;;  %v743_v49 = vpop.f32.mrb[2].mxu1 }
 0x264   : > { %772 = vst [vmem:[%s244_s8] sm:$0xff] %v768_v0  ;;  %v766_v50 = vadd.f32 %v757_v42, %v743_v49  ;;  %v745_v51 = vpop.f32.mrb[3].mxu1 }
 0x265   : > { %773 = vst [vmem:[%s244_s8 + $0x8] sm:$0xff] %v769_v48  ;;  %v767_v52 = vadd.f32 %v761_v43, %v745_v51 }
 0x266   : > { %v770_v53 = vmax.f32 %v766_v50, 0.0 }
 0x267   : > { %v771_v54 = vmax.f32 %v767_v52, 0.0 }
 0x268   : > { %774 = vst [vmem:[%s244_s8 + $0x10] sm:$0xff] %v770_v53 }
 0x269   : > { %775 = vst [vmem:[%s244_s8 + $0x18] sm:$0xff] %v771_v54 }
 0x26a   : > { %1191 = shalt.err (!%p1188_p2)
}
 0x26b   : > { %s1192_s13 = scalar_lea.hbm %s1514_s27, 512  ;;  %s1196_s21 = scalar_lea.hbm %s1562_s4, 1024 }
 0x26c   : > { %p1193_p13 = scmp.ne.s32.totalorder %s1514_s27, %s1192_s13  ;;  %p1197_p4 = scmp.lt.u32.totalorder %s1514_s27, %s1562_s4 }
 0x26d   : > { %p1198_p7 = scmp.lt.u32.totalorder %s1196_s21, %s1192_s13  ;;  %p1200_p11 = scmp.lt.u32.totalorder %s1192_s13, %s1514_s27 }
 0x26e   : > { %p1194_p6 = pnand %p1193_p13, %p1576_p0 }
 0x26f   : > { %p1199_p8 = por %p1198_p7, %p1197_p4 }
 0x270   : > { %p1195_p10 = pneg %p1194_p6 }
 0x271   : > { %p1201_p1 = por %p1200_p11, %p1199_p8 }
 0x273   : > { %p1202_p3 = pnand %p1201_p1, %p1195_p10 }
 0x275   : > { %1205 = shalt.err (!%p1202_p3)
}
 0x276   : > { %s1259_s8 = smov 256   ;;  %s1260_s6 = smov 16  }
 0x277   : > { %1028 = dma.vmem_to_hbm [thread:$0]  (%p1576_p0), %s1509_s30, 512, %s1514_s27, %s777_s19, %s1259_s8, %s1259_s8, %s1260_s6  }
 0x278 PF: > { %s805_s25 = sand.u32 1, %s1236_s15   ;;  %p1577_p5 = scmp.ne.s32.totalorder %s1567_s22, 0 }
 0x279   : > { %p1578_p9 = scmp.ge.s32.totalorder %s1248_s18, 2  ;;  %s806_s9 = scalar_lea.sflag [#allocation4], %s805_s25 }
 0x27b   : > { %p1042_p12 = pnand %p1578_p9, %p1577_p5 }
 0x27d   : > { %1231 = dma.done.wait (!%p1042_p12), %s806_s9, 512  }
 0x27e   : > { %1233 = vsyncadd (!%p1042_p12), %s806_s9, 4294966784  ;;  %p18_p2 = scmp.ge.s32.totalorder %s1399_s11, 4   ;;  %s1579_s15 = smov %s1240_s16 }
 0x27f   : > { %s1580_s16 = smov %s1244_s17  ;;  %s1581_s17 = smov %s1408_s14 }
 0x280   : > { %s1582_s18 = smov %s1399_s11  ;;  %20 = sbr.rel (!%p18_p2) target bundleno = 6 (0x6), region = 92 }
 0x287   :  { %811 = vsyncpa [#allocation3], 1 }
 0x288   :  { %813 = vsyncpa [#allocation3 + $0x1], 1 }
 0x289   :  { %814 = vsyncpa [#allocation6], 1 }
 0x28a   :  { %815 = vsyncpa [#allocation4], 1 }
 0x28b   :  { %817 = vsyncpa [#allocation4 + $0x1], 1 }

</bundles_post_ra>
